<compile_context>
chip_gen: v5e
topology: v5e:2x2
jax: 0.10.0
libtpu: 0.0.40
codegen_flags: <defaults>
</compile_context>

<pallas_src>
import jax
import jax.numpy as jnp
from jax.experimental import pallas as pl
from jax.experimental.pallas import tpu as pltpu

_LANES = 128
_ROW_ALIGN = 256          # keeps row tiles sublane-aligned and DMA-friendly
_MIN_ROWS = 256           # smallest row tile considered by the byte-targeted search


def _round_up(x, m):
    return ((x + m - 1) // m) * m


def _vmem_budgets():
    """Returns (per-buffer z+out target bytes, double-buffered cap, vmem_limit cap)."""
    try:
        cap = int(getattr(pltpu.get_tpu_info(), "vmem_capacity_bytes", 64 << 20))
    except Exception:
        cap = 64 << 20                        # unknown backend: assume the smallest part
    if cap >= (100 << 20):                    # v5e / v6e: 128 MiB VMEM per TensorCore
        return 12 << 20, 48 << 20, 96 << 20
    return 8 << 20, 20 << 20, 48 << 20        # v7x: 64 MiB VMEM per TensorCore


def _pick_tile_rows(batch, row_vmem_bytes, pair_target, db_cap):
    """Largest row tile whose double-buffered (z tile + out tile) VMEM fits the budget."""
    tb = max(_MIN_ROWS, (pair_target // row_vmem_bytes) // _ROW_ALIGN * _ROW_ALIGN)
    while tb > 8 and 2 * tb * row_vmem_bytes > db_cap:
        tb = max(8, tb // 2)
    if batch >= 2 * _MIN_ROWS:
        # Keep >=2 grid steps for large batches so dimension_semantics=("parallel",)
        # can actually split the batch axis across v7x's two TensorCores.
        tb = min(tb, _round_up(pl.cdiv(batch, 2), _ROW_ALIGN))
    else:
        tb = min(tb, _round_up(batch, 8))     # single (possibly partial) block
    return max(int(tb), 8)


def _logdet_kernel(scal_ref, z_ref, w_ref, o_ref):
    # scal_ref: SMEM (1, 2) -> [bias, sum(weight*scale)]   (grid-invariant, hoisted)
    # z_ref:    VMEM (TB, D) row tile of z
    # w_ref:    VMEM (1, D)  weight row                    (grid-invariant)
    # o_ref:    VMEM (TB, 1) output tile (stored thin; see module header)
    bias = scal_ref[0, 0]
    ws = scal_ref[0, 1]

    # linear(z, weight, bias): exact-f32 VPU multiply + XLU lane reduce.
    u = jnp.sum(z_ref[...] * w_ref[...], axis=-1, keepdims=True) + bias   # (TB, 1)
    t = jnp.tanh(u)                                                       # EUP
    o_ref[...] = jnp.log(jnp.abs(1.0 + (1.0 - t * t) * ws))               # (TB, 1)


def logdet_jacobian(z, weight, scale, bias):
    """z: (B, z_dim); weight, scale: (1, z_dim); bias: scalar  ->  (B, 1) float32."""
    z = jnp.asarray(z, jnp.float32)
    weight = jnp.asarray(weight, jnp.float32)
    scale = jnp.asarray(scale, jnp.float32)
    B, D = z.shape

    # Grid-invariant scalars hoisted to the host (tiny SMEM block):
    #   psi @ scale.T == (1 - tanh(layer)^2) * sum(weight * scale)   (weight broadcasts).
    ws = jnp.sum(weight * scale)
    scal = jnp.stack(
        [jnp.asarray(bias, jnp.float32).reshape(()), ws.reshape(())]
    ).reshape(1, 2)

    d_pad = _round_up(D, _LANES)              # lane padding of the z tile in VMEM
    row_vmem_bytes = (d_pad + _LANES) * 4     # z row + lane-padded thin output row

    pair_target, db_cap, limit_cap = _vmem_budgets()
    tb = _pick_tile_rows(B, row_vmem_bytes, pair_target, db_cap)
    grid = (pl.cdiv(B, tb),)

    # Double-buffered z + out tiles, grid-invariant weight, plus internal-scratch headroom.
    vmem_limit = 2 * tb * row_vmem_bytes + 2 * 8 * d_pad * 4 + (4 << 20)
    vmem_limit = int(min(max(vmem_limit, 16 << 20), limit_cap))

    out = pl.pallas_call(
        _logdet_kernel,
        out_shape=jax.ShapeDtypeStruct((B, 1), jnp.float32),
        grid=grid,
        in_specs=[
            pl.BlockSpec(memory_space=pltpu.MemorySpace.SMEM),   # (1, 2) hoisted scalars
            pl.BlockSpec((tb, D), lambda i: (i, 0)),             # z row tile
            pl.BlockSpec((1, D), lambda i: (0, 0)),              # weight (grid-invariant)
        ],
        out_specs=pl.BlockSpec((tb, 1), lambda i: (i, 0)),
        compiler_params=pltpu.CompilerParams(
            dimension_semantics=("parallel",),
            vmem_limit_bytes=vmem_limit,
        ),
    )(scal, z, weight)
    return out


def logdet_jacobian_ref(z, weight, scale, bias):
    """Pure-JAX reference mirroring the PyTorch forward exactly."""
    layer = z @ weight.T + bias                      # (B, 1)
    psi = (1.0 - jnp.tanh(layer) ** 2) * weight      # (B, D)
    return jnp.log(jnp.abs(1.0 + psi @ scale.T))     # (B, 1)


if __name__ == "__main__":
    Z_DIM = 32

    # Parameters mirroring NormalizingFlow.__init__: bias=1.0, weight=ones, scale=ones.
    weight = jnp.ones((1, Z_DIM), dtype=jnp.float32)
    scale = jnp.ones((1, Z_DIM), dtype=jnp.float32)
    bias = jnp.float32(1.0)

    key = jax.random.PRNGKey(0)

    # Batch sizes exercising every tiling path:
    #   8    -> single tiny block (B < 128)
    #   256  -> single full block (the size that exposed the old lane-dense bug)
    #   2000 -> grid of 2 steps with a partial final tile (megacore split path)
    for i, batch in enumerate((8, 256, 2000)):
        k = jax.random.fold_in(key, i)
        z = jax.random.normal(k, (batch, Z_DIM), dtype=jnp.float32)
        out = jax.block_until_ready(logdet_jacobian(z, weight, scale, bias))
        ref = logdet_jacobian_ref(z, weight, scale, bias)
        assert out.shape == (batch, 1), (out.shape, batch)
        max_diff = float(jnp.max(jnp.abs(out - ref)))
        # Tolerance allows a couple of ulps of EUP-vs-XLA tanh divergence, which the
        # log|1 + ws*(1 - tanh^2)| chain amplifies by up to ~2*ws.
        assert jnp.allclose(out, ref, atol=5e-5, rtol=1e-4), (batch, max_diff)

    print("KERNEL_OK")
</pallas_src>

<mosaic_0001>
module attributes {stable_mosaic.version = 11 : i64} {
  func.func @_logdet_kernel(%arg0: i32, %arg1: memref<1x2xf32, #tpu.memory_space<smem>>, %arg2: memref<8x32xf32, #tpu.memory_space<vmem>>, %arg3: memref<1x32xf32, #tpu.memory_space<vmem>>, %arg4: memref<8x1xf32, #tpu.memory_space<vmem>>) attributes {dimension_semantics = [#tpu.dimension_semantics<parallel>], iteration_bounds = array<i64: 1>, scalar_prefetch = 0 : i64, scratch_operands = 0 : i64, tpu.core_type = #tpu.core_type<tc>, window_params = [{transform_indices = @transform_0, window_bounds = array<i64: 1, 2>}, {transform_indices = @transform_1, window_bounds = array<i64: 8, 32>}, {pipeline_mode = #tpu.pipeline_mode<synchronous>, transform_indices = @transform_2, window_bounds = array<i64: 1, 32>}, {transform_indices = @transform_3, window_bounds = array<i64: 8, 1>}]} {
    %c0 = arith.constant 0 : index
    %c0_0 = arith.constant 0 : index
    %0 = memref.load %arg1[%c0, %c0_0] : memref<1x2xf32, #tpu.memory_space<smem>>
    %c0_1 = arith.constant 0 : index
    %c1 = arith.constant 1 : index
    %1 = memref.load %arg1[%c0_1, %c1] : memref<1x2xf32, #tpu.memory_space<smem>>
    %c0_2 = arith.constant 0 : index
    %c0_3 = arith.constant 0 : index
    %2 = vector.load %arg2[%c0_2, %c0_3] : memref<8x32xf32, #tpu.memory_space<vmem>>, vector<8x32xf32>
    %c0_4 = arith.constant 0 : index
    %c0_5 = arith.constant 0 : index
    %3 = vector.load %arg3[%c0_4, %c0_5] : memref<1x32xf32, #tpu.memory_space<vmem>>, vector<1x32xf32>
    %4 = vector.broadcast %3 : vector<1x32xf32> to vector<8x32xf32>
    %5 = arith.mulf %2, %4 : vector<8x32xf32>
    %cst = arith.constant dense<0.000000e+00> : vector<8xf32>
    %6 = vector.multi_reduction <add>, %5, %cst [1] : vector<8x32xf32> to vector<8xf32>
    %7 = vector.shape_cast %6 : vector<8xf32> to vector<8x1xf32>
    %8 = vector.broadcast %0 : f32 to vector<8x1xf32>
    %9 = arith.addf %7, %8 : vector<8x1xf32>
    %10 = math.tanh %9 : vector<8x1xf32>
    %11 = arith.mulf %10, %10 : vector<8x1xf32>
    %cst_6 = arith.constant 1.000000e+00 : f32
    %12 = vector.broadcast %cst_6 : f32 to vector<8x1xf32>
    %13 = arith.subf %12, %11 : vector<8x1xf32>
    %14 = vector.broadcast %1 : f32 to vector<8x1xf32>
    %15 = arith.mulf %13, %14 : vector<8x1xf32>
    %cst_7 = arith.constant 1.000000e+00 : f32
    %16 = vector.broadcast %cst_7 : f32 to vector<8x1xf32>
    %17 = arith.addf %16, %15 : vector<8x1xf32>
    %18 = math.absf %17 : vector<8x1xf32>
    %19 = math.log %18 : vector<8x1xf32>
    %c0_8 = arith.constant 0 : index
    %c0_9 = arith.constant 0 : index
    %20 = vector.load %arg4[%c0_8, %c0_9] : memref<8x1xf32, #tpu.memory_space<vmem>>, vector<8x1xf32>
    tpu.vector_store %arg4[%c0_8, %c0_9], %19 {strides = array<i32>} : memref<8x1xf32, #tpu.memory_space<vmem>>, vector<8x1xf32>,
    return
  }
  func.func @transform_0(%arg0: i32) -> (i32, i32) {
    %c0_i32 = arith.constant 0 : i32
    %c0_i32_0 = arith.constant 0 : i32
    %c0_i32_1 = arith.constant 0 : i32
    return %c0_i32, %c0_i32_0 : i32, i32
  }
  func.func @transform_1(%arg0: i32) -> (i32, i32) {
    %c0_i32 = arith.constant 0 : i32
    %c0_i32_0 = arith.constant 0 : i32
    return %arg0, %c0_i32 : i32, i32
  }
  func.func @transform_2(%arg0: i32) -> (i32, i32) {
    %c0_i32 = arith.constant 0 : i32
    %c0_i32_0 = arith.constant 0 : i32
    %c0_i32_1 = arith.constant 0 : i32
    return %c0_i32, %c0_i32_0 : i32, i32
  }
  func.func @transform_3(%arg0: i32) -> (i32, i32) {
    %c0_i32 = arith.constant 0 : i32
    %c0_i32_0 = arith.constant 0 : i32
    return %arg0, %c0_i32 : i32, i32
  }
}

</mosaic_0001>

<bundles_post_ra>
// kernel: tpu_custom_call.1
= control target key start
LH: loop header
LB: loop body
LE: loop exit
PB: predicated region body
PF: predicated region fallthrough
CT: control target
= control target key end

     0   :  { %8 = vsyncpa [#allocation4], 0  ;;  %s154_s0 = inlined_call_operand.hbm [shape: f32[1,2], index: 0, kind: input, shape index: {}]   ;;  %s155_s1 = inlined_call_operand.hbm [shape: f32[8,32], index: 1, kind: input, shape index: {}]   ;;  %s156_s2 = inlined_call_operand.vmem [shape: f32[1,32], index: 2, kind: input, shape index: {}]   ;;  %s157_s3 = inlined_call_operand.vmem [shape: f32[8,1], index: 3, kind: output, shape index: {}]  }
   0x1   :  { %s15_s14 = sshll.u32 %s154_s0, 4  ;;  %s16_s14 = int_to_ptr.hbm [resolvable:$true] %s15_s14 }
   0x2   :  { %9 = vsyncpa [#allocation3], 0  ;;  %s24_s17 = sshll.u32 %s155_s1, 4  ;;  %s120_s18 = smov [#allocation2]   ;;  %s25_s17 = int_to_ptr.hbm [resolvable:$true] %s24_s17 }
   0x3   :  { %18 = dma.hbm_to_smem %s16_s14, 16, %s120_s18, [#allocation4]  }
   0x4   :  { %s121_s19 = smov [#allocation5]  }
   0x5   :  { %s26_s20 = sshll.u32 %s121_s19, 4  ;;  %s27_s20 = int_to_ptr.vmem [resolvable:$true] %s26_s20 }
   0x6   :  { %29 = dma.hbm_to_vmem [thread:$0]  %s25_s17, 128, %s27_s20, [#allocation3]  }
   0x7   :  { %116 = dma.done.wait [#allocation4], 16  }
   0x8   :  { %117 = vsyncadd [#allocation4], 4294967280 }
   0x9   :  { %118 = dma.done.wait [#allocation3], 128  }
   0xa   :  { %119 = vsyncadd [#allocation3], 4294967168 }
   0xb   :  { %40 = sfence }
   0xc   :  { %v43_v0 = vld [vmem:[#allocation5] sm:$0xff]  ;;  %vm49_vm0 = vcmask 261120   ;;  %s41_s1 = sld [smem:[#allocation2]]  ;;  %vm64_vm1 = vcmask 7168  }
   0xd   :  { %v75_v1 = vld [vmem:[%s156_s2] ss:$0 sm:$0xff]  ;;  %s72_s22 = sld [smem:[#allocation2 + $0x1]] }
   0xe   :  { %v48_v2 = vmul.f32 %v75_v1, %v43_v0 }
  0x10   :  { %v50_v3 = vsel %vm49_vm0, %v48_v2, 0.0 }
  0x11   :  { %51 = vadd.xlane.f32.xlu0 %v50_v3 }
  0x12   :  { %v53_v4 = vstv %s41_s1 }
  0x13   :  { %v58_v9 = vstv %s72_s22 }
  0x84   :  { %v52_v5 = vpop.xlane.xlu0 %51 }
  0x85   :  { %v54_v6 = vadd.f32 %v53_v4, %v52_v5 }
  0x87   :  { %76 = vtanh.f32 %v54_v6 }
  0x8d   :  { %v77_v7 = vpop.eup %76 }
  0x8e   :  { %v56_v8 = vmul.f32 %v77_v7, %v77_v7 }
  0x90   :  { %v57_v10 = vsub.f32 1.0, %v56_v8 }
  0x92   :  { %v59_v11 = vmul.f32 %v58_v9, %v57_v10 }
  0x94   :  { %v60_v12 = vadd.f32 1.0, %v59_v11 }
  0x96   :  { %v61_v13 = vand.u32 2147483647, %v60_v12 }
  0x98   :  { %78 = vlog2.f32 %v61_v13 }
  0x9e   :  { %v79_v14 = vpop.eup %78 }
  0x9f   :  { %v63_v15 = vmul.f32 0.6931472, %v79_v14 }
  0xa1   :  { %65 = vst.msk [vmem:[%s157_s3] sm:$0xff] %vm64_vm1, %v63_v15 }
  0xa2   :  { %70 = vsyncpa [#allocation3], 1 }
  0xa3   :  { %71 = vsyncpa [#allocation4], 1 }

</bundles_post_ra>
